<compile_context>
chip_gen: v7x
topology: tpu7x:2x2x1
jax: 0.10.0
libtpu: 0.0.40
codegen_flags: <defaults>
</compile_context>

<pallas_src>
import math

import jax
import jax.numpy as jnp
from jax import lax
from jax.experimental import pallas as pl
from jax.experimental.pallas import tpu as pltpu

_EPS = 1e-8
_LANE = 128


def _cdiv(a, b):
    return -(-a // b)


def _round_up(a, b):
    return _cdiv(a, b) * b


def _vmem_capacity_bytes():
    # Generation-aware VMEM cap; conservative (v7x per-TC) fallback.
    try:
        cap = getattr(pltpu.get_tpu_info(), "vmem_capacity_bytes", None)
        if cap:
            return int(cap)
    except Exception:
        pass
    return 64 * 1024 * 1024


def _make_pixelnorm_kernel(C, G, mul_in_input_dtype):
    # Plain Python floats: folded into the jaxpr as literals (no captured
    # jnp-array constants, which pallas_call rejects).
    inv_c = 1.0 / float(C)
    eps = float(_EPS)

    def kernel(x_ref, o_ref):
        x = x_ref[...]                          # (B_TILE, G*C, HW_TILE)
        xf = x.astype(jnp.float32)
        sq = xf * xf
        if G == 1:
            ss = jnp.sum(sq, axis=1, keepdims=True)           # (B, 1, HW)
            scale = lax.rsqrt(ss * inv_c + eps)               # (B, 1, HW)
        else:
            # G images packed on the sublane axis: masked segmented reduce.
            # Iota is (1, GC, 1) and broadcasts; scale is accumulated (no
            # full-size zeros init / where-select chain).
            row = lax.broadcasted_iota(jnp.int32, (1, G * C, 1), 1)
            scale = None
            for g in range(G):                                 # static, small G
                in_g = (row >= g * C) & (row < (g + 1) * C)    # (1, GC, 1)
                ss_g = jnp.sum(jnp.where(in_g, sq, 0.0), axis=1, keepdims=True)
                sc_g = lax.rsqrt(ss_g * inv_c + eps)           # (B, 1, HW)
                term = in_g.astype(jnp.float32) * sc_g         # (B, GC, HW)
                scale = term if scale is None else scale + term
        if mul_in_input_dtype:
            y = x * scale.astype(x.dtype)       # native 16-bit float multiply
        else:
            y = xf * scale                      # f32 multiply, single downcast
        o_ref[...] = y.astype(o_ref.dtype)

    return kernel


def pixel_norm(x, *, target_block_bytes=8 * 1024 * 1024,
               min_block_bytes=1 * 1024 * 1024):
    """PixelNorm forward. x: (N, C, H, W) -> (N, C, H, W)."""
    N, C, H, W = x.shape
    HW = H * W
    itemsize = jnp.dtype(x.dtype).itemsize

    vmem_cap = _vmem_capacity_bytes()
    # Keep ~4 live blocks (double-buffered in + out) plus slack inside VMEM.
    target_block_bytes = min(target_block_bytes, max(256 * 1024, vmem_cap // 6))

    # --- sublane packing: fold G images into the channel axis when C alone
    #     would waste sublanes (native sublane tile = 8/16/32 rows for 4/2/1B).
    sub = 8 * (4 // itemsize) if itemsize in (1, 2, 4) else 8
    G = 1
    if C % sub != 0:
        g = sub // math.gcd(C, sub)
        if N % g == 0 and g * C <= 1024:
            G = g
    NB = N // G
    GC = G * C

    # --- lane (H*W) tiling: 128-multiples, no wrapper pad; edge block may be
    #     partial (Pallas masks OOB writes).  HW < 128 -> full-extent block.
    if HW <= _LANE:
        hw_tile = HW
    else:
        max_lanes = max(
            _LANE, (target_block_bytes // (GC * itemsize)) // _LANE * _LANE)
        hw_tile = min(max_lanes, (HW // _LANE) * _LANE)
    n_hw_tiles = _cdiv(HW, hw_tile)

    # --- batch folding with a cdiv grid (partial last batch block allowed).
    block_bytes = GC * hw_tile * itemsize
    if block_bytes < min_block_bytes and NB > 1:
        b_tile = min(NB, max(1, target_block_bytes // block_bytes))
    else:
        b_tile = 1
    n_b_tiles = _cdiv(NB, b_tile)

    # --- v7x megacore: make sure both TensorCores get work when possible.
    if n_b_tiles * n_hw_tiles == 1:
        if NB >= 2:
            b_tile = _cdiv(NB, 2)
            n_b_tiles = _cdiv(NB, b_tile)
        elif HW > _LANE:
            half = _round_up(_cdiv(HW, 2), _LANE)
            if half < HW:
                hw_tile = half
                n_hw_tiles = _cdiv(HW, hw_tile)

    block_bytes = GC * hw_tile * itemsize
    vmem_limit_bytes = int(min(
        max(32 * 1024 * 1024, 4 * b_tile * block_bytes + (4 << 20)),
        int(0.9 * vmem_cap)))

    # --- wrapper-side layout plumbing: a single free reshape (contiguous NCHW),
    #     no pad, no post-slice.
    x3 = x.reshape(NB, GC, HW)

    mul_in_input_dtype = (jnp.issubdtype(x.dtype, jnp.floating) and itemsize == 2)
    kernel = _make_pixelnorm_kernel(C=C, G=G, mul_in_input_dtype=mul_in_input_dtype)

    out3 = pl.pallas_call(
        kernel,
        out_shape=jax.ShapeDtypeStruct((NB, GC, HW), x.dtype),
        grid_spec=pltpu.PrefetchScalarGridSpec(
            num_scalar_prefetch=0,
            grid=(n_b_tiles, n_hw_tiles),
            in_specs=[pl.BlockSpec((b_tile, GC, hw_tile), lambda b, s: (b, 0, s))],
            out_specs=pl.BlockSpec((b_tile, GC, hw_tile), lambda b, s: (b, 0, s)),
        ),
        compiler_params=pltpu.CompilerParams(
            dimension_semantics=("parallel", "parallel"),
            vmem_limit_bytes=vmem_limit_bytes,
        ),
    )(x3)

    return out3.reshape(N, C, H, W)


def _reference(x):
    xf = x.astype(jnp.float32)
    ms = jnp.mean(xf * xf, axis=1, keepdims=True)
    return (xf * lax.rsqrt(ms + _EPS)).astype(x.dtype)


if __name__ == "__main__":
    key = jax.random.PRNGKey(0)

    # Primary case consistent with the module (PixelNorm has no params):
    # C=4 f32 exercises the sublane-packing path (G=2) and the dual-TC split.
    x = jax.random.normal(key, (2, 4, 16, 16), dtype=jnp.float32)
    y = pixel_norm(x)
    jax.block_until_ready(y)
    y_ref = _reference(x)
    assert y.shape == x.shape and y.dtype == x.dtype
    assert jnp.allclose(y, y_ref, atol=1e-5, rtol=1e-5)

    # Secondary checks: overhanging lane edge block (HW % 128 != 0) and the
    # batch-folding / cdiv-grid path (many tiny images per grid step).
    for shape in ((1, 8, 10, 13), (8, 8, 4, 8)):
        x2 = jax.random.normal(jax.random.PRNGKey(1), shape, dtype=jnp.float32)
        y2 = pixel_norm(x2)
        jax.block_until_ready(y2)
        assert jnp.allclose(y2, _reference(x2), atol=1e-5, rtol=1e-5)

    # 16-bit float path (multiply kept in input dtype).
    xb = jax.random.normal(jax.random.PRNGKey(2), (2, 8, 8, 16), dtype=jnp.bfloat16)
    yb = pixel_norm(xb)
    jax.block_until_ready(yb)
    assert jnp.allclose(yb.astype(jnp.float32),
                        _reference(xb).astype(jnp.float32),
                        atol=8e-2, rtol=5e-2)

    print("KERNEL_OK")
</pallas_src>

<mosaic_0001>
module attributes {stable_mosaic.version = 11 : i64} {
  func.func @kernel(%arg0: i32, %arg1: i32, %arg2: memref<1x8x128xf32, #tpu.memory_space<vmem>>, %arg3: memref<1x8x128xf32, #tpu.memory_space<vmem>>) attributes {dimension_semantics = [#tpu.dimension_semantics<parallel>, #tpu.dimension_semantics<parallel>], iteration_bounds = array<i64: 1, 2>, scalar_prefetch = 0 : i64, scratch_operands = 0 : i64, tpu.core_type = #tpu.core_type<tc>, window_params = [{transform_indices = @transform_0, window_bounds = array<i64: 1, 8, 128>}, {transform_indices = @transform_1, window_bounds = array<i64: 1, 8, 128>}]} {
    %c0 = arith.constant 0 : index
    %c0_0 = arith.constant 0 : index
    %c0_1 = arith.constant 0 : index
    %0 = vector.load %arg2[%c0, %c0_0, %c0_1] : memref<1x8x128xf32, #tpu.memory_space<vmem>>, vector<1x8x128xf32>
    %1 = arith.mulf %0, %0 : vector<1x8x128xf32>
    %2 = tpu.iota {dimensions = array<i32: 1>} : vector<1x8x1xi32>
    %c0_i32 = arith.constant 0 : i32
    %3 = vector.broadcast %c0_i32 : i32 to vector<1x8x1xi32>
    %4 = arith.cmpi sge, %2, %3 : vector<1x8x1xi32>
    %c4_i32 = arith.constant 4 : i32
    %5 = vector.broadcast %c4_i32 : i32 to vector<1x8x1xi32>
    %6 = arith.cmpi slt, %2, %5 : vector<1x8x1xi32>
    %7 = arith.andi %4, %6 : vector<1x8x1xi1>
    %cst = arith.constant 0.000000e+00 : f32
    %8 = vector.shape_cast %7 : vector<1x8x1xi1> to vector<1x8x1xi1>
    %9 = vector.broadcast %8 : vector<1x8x1xi1> to vector<1x8x128xi1>
    %10 = vector.broadcast %cst : f32 to vector<1x8x128xf32>
    %11 = arith.select %9, %1, %10 : vector<1x8x128xi1>, vector<1x8x128xf32>
    %cst_2 = arith.constant dense<0.000000e+00> : vector<1x128xf32>
    %12 = vector.multi_reduction <add>, %11, %cst_2 [1] : vector<1x8x128xf32> to vector<1x128xf32>
    %13 = vector.shape_cast %12 : vector<1x128xf32> to vector<1x1x128xf32>
    %cst_3 = arith.constant 2.500000e-01 : f32
    %14 = vector.broadcast %cst_3 : f32 to vector<1x1x128xf32>
    %15 = arith.mulf %13, %14 : vector<1x1x128xf32>
    %cst_4 = arith.constant 9.99999993E-9 : f32
    %16 = vector.broadcast %cst_4 : f32 to vector<1x1x128xf32>
    %17 = arith.addf %15, %16 : vector<1x1x128xf32>
    %18 = math.rsqrt %17 : vector<1x1x128xf32>
    %19 = arith.extui %7 : vector<1x8x1xi1> to vector<1x8x1xi32>
    %20 = arith.sitofp %19 : vector<1x8x1xi32> to vector<1x8x1xf32>
    %21 = vector.broadcast %20 : vector<1x8x1xf32> to vector<1x8x128xf32>
    %22 = vector.broadcast %18 : vector<1x1x128xf32> to vector<1x8x128xf32>
    %23 = arith.mulf %21, %22 : vector<1x8x128xf32>
    %c4_i32_5 = arith.constant 4 : i32
    %24 = vector.broadcast %c4_i32_5 : i32 to vector<1x8x1xi32>
    %25 = arith.cmpi sge, %2, %24 : vector<1x8x1xi32>
    %c8_i32 = arith.constant 8 : i32
    %26 = vector.broadcast %c8_i32 : i32 to vector<1x8x1xi32>
    %27 = arith.cmpi slt, %2, %26 : vector<1x8x1xi32>
    %28 = arith.andi %25, %27 : vector<1x8x1xi1>
    %cst_6 = arith.constant 0.000000e+00 : f32
    %29 = vector.shape_cast %28 : vector<1x8x1xi1> to vector<1x8x1xi1>
    %30 = vector.broadcast %29 : vector<1x8x1xi1> to vector<1x8x128xi1>
    %31 = vector.broadcast %cst_6 : f32 to vector<1x8x128xf32>
    %32 = arith.select %30, %1, %31 : vector<1x8x128xi1>, vector<1x8x128xf32>
    %cst_7 = arith.constant dense<0.000000e+00> : vector<1x128xf32>
    %33 = vector.multi_reduction <add>, %32, %cst_7 [1] : vector<1x8x128xf32> to vector<1x128xf32>
    %34 = vector.shape_cast %33 : vector<1x128xf32> to vector<1x1x128xf32>
    %cst_8 = arith.constant 2.500000e-01 : f32
    %35 = vector.broadcast %cst_8 : f32 to vector<1x1x128xf32>
    %36 = arith.mulf %34, %35 : vector<1x1x128xf32>
    %cst_9 = arith.constant 9.99999993E-9 : f32
    %37 = vector.broadcast %cst_9 : f32 to vector<1x1x128xf32>
    %38 = arith.addf %36, %37 : vector<1x1x128xf32>
    %39 = math.rsqrt %38 : vector<1x1x128xf32>
    %40 = arith.extui %28 : vector<1x8x1xi1> to vector<1x8x1xi32>
    %41 = arith.sitofp %40 : vector<1x8x1xi32> to vector<1x8x1xf32>
    %42 = vector.broadcast %41 : vector<1x8x1xf32> to vector<1x8x128xf32>
    %43 = vector.broadcast %39 : vector<1x1x128xf32> to vector<1x8x128xf32>
    %44 = arith.mulf %42, %43 : vector<1x8x128xf32>
    %45 = arith.addf %23, %44 : vector<1x8x128xf32>
    %46 = arith.mulf %0, %45 : vector<1x8x128xf32>
    %c0_10 = arith.constant 0 : index
    %c0_11 = arith.constant 0 : index
    %c0_12 = arith.constant 0 : index
    %47 = vector.load %arg3[%c0_10, %c0_11, %c0_12] : memref<1x8x128xf32, #tpu.memory_space<vmem>>, vector<1x8x128xf32>
    tpu.vector_store %arg3[%c0_10, %c0_11, %c0_12], %46 {strides = array<i32>} : memref<1x8x128xf32, #tpu.memory_space<vmem>>, vector<1x8x128xf32>,
    return
  }
  func.func @transform_0(%arg0: i32, %arg1: i32) -> (i32, i32, i32) {
    %c0_i32 = arith.constant 0 : i32
    %c0_i32_0 = arith.constant 0 : i32
    return %arg0, %c0_i32, %arg1 : i32, i32, i32
  }
  func.func @transform_1(%arg0: i32, %arg1: i32) -> (i32, i32, i32) {
    %c0_i32 = arith.constant 0 : i32
    %c0_i32_0 = arith.constant 0 : i32
    return %arg0, %c0_i32, %arg1 : i32, i32, i32
  }
}

</mosaic_0001>

<bundles_post_ra>
// kernel: tpu_custom_call.1
= control target key start
LH: loop header
LB: loop body
LE: loop exit
PB: predicated region body
PF: predicated region fallthrough
CT: control target
= control target key end

     0   :  { %6 = vsyncpa [#allocation3], 0  ;;  %s678_s0 = inlined_call_operand.hbm [shape: f32[1,8,256], index: 0, kind: input, shape index: {}]   ;;  %s679_s1 = inlined_call_operand.hbm [shape: f32[1,8,256], index: 1, kind: output, shape index: {}]  }
   0x1   :  { %8 = vsyncpa [#allocation3 + $0x1], 0 }
   0x2   :  { %9 = vsyncpa [#allocation4], 0 }
   0x3   :  { %11 = vsyncpa [#allocation4 + $0x1], 0  ;;  %s498_s6 = smov 0   ;;  %s500_s7 = smov 0  }
   0x4   :  { %s502_s8 = smov 0   ;;  %s504_s9 = smov 0  }
   0x5   :  { %s506_s10 = smov 0   ;;  %s508_s11 = smov 0  }
   0x6 LB: > { %s289_s12 = sadd.s32 4294967295, %s483_s11   ;;  %s290_s13 = sadd.s32 4294967294, %s483_s11   ;;  %s483_s11 = sphi %s508_s11, %s17_s11   ;;  %s479_s10 = sphi %s506_s10, %s695_s10   ;;  %s475_s9 = sphi %s504_s9, %s694_s9   ;;  %s471_s8 = sphi %s502_s8, %s693_s8   ;;  %s467_s7 = sphi %s500_s7, %s692_s7   ;;  %s463_s6 = sphi %s498_s6, %s691_s6  }
   0x7   : > { %s26_s14 = sadd.s32 1, %s479_s10  ;;  %s38_s15 = sadd.s32 1, %s471_s8 }
   0x8   : > { %p27_p0 = scmp.ge.s32.totalorder %s26_s14, 2  ;;  %p45_p1 = scmp.ne.s32.totalorder %s471_s8, %s467_s7 }
   0x9   : > { %p46_p2 = scmp.eq.s32.totalorder %s483_s11, 0  ;;  %p51_p3 = scmp.ne.s32.totalorder %s467_s7, %s463_s6 }
   0xa   : > { %s697_s14 = smov (%p27_p0, %s26_s14), 0  ;;  %p52_p5 = scmp.eq.s32.totalorder %s289_s12, 0 }
   0xb   : > { %p539_p4 = por %p46_p2, %p45_p1  ;;  %s34_s17 = ssub.s32 %s479_s10, %s697_s14 }
   0xc   : > { %p77_p6 = scmp.eq.s32.totalorder %s289_s12, 1  ;;  %p36_p7 = scmp.eq.s32.totalorder %s34_s17, 0 }
   0xd   : > { %p545_p8 = por %p52_p5, %p51_p3  ;;  %p83_p10 = scmp.eq.s32.totalorder %s290_s13, 1 }
   0xe   : > { %p549_p9 = por %p77_p6, %p45_p1  ;;  %p316_p13 = scmp.lt.s32.totalorder %s483_s11, 2 }
   0xf   : > { %s554_s20 = scalar_select %p36_p7, %s471_s8, %s38_s15  }
  0x10   : > { %s683_s19 = scalar_select %p549_p9, 1, 0 }
  0x11   : > { %p556_p11 = por %p83_p10, %p51_p3  ;;  %s103_s22 = sand.u32 1, %s471_s8  }
  0x12   : > { %s293_s23 = sshll.u32 %s103_s22, 3  ;;  %s294_s24 = sshll.u32 %s479_s10, 7 }
  0x13   : > { %s684_s21 = scalar_select %p556_p11, 1, 0 }
  0x14   : > { %s567_s27 = scalar_lea.hbm %s678_s0, %s294_s24  ;;  %s107_s28 = scalar_lea.vmem [#allocation2], %s293_s23 }
  0x15   : > { %s116_s29 = sshll.u32 %s107_s28, 4  ;;  %p573_p0 = pnand %p316_p13, %p539_p4  ;;  %s569_s29 = int_to_ptr.vmem [resolvable:$true] %s116_s29 }
  0x16   : > { %s104_s2 = scalar_lea.sflag [#allocation3], %s103_s22  ;;  %s371_s3 = scalar_lea.hbm %s567_s27, 128 }
  0x17   : > { %p372_p3 = scmp.ne.s32.totalorder %s567_s27, %s371_s3  ;;  %p373_p5 = pneg %p573_p0 }
  0x18   : > { %s376_s12 = scalar_lea.hbm %s678_s0, 256  ;;  %p377_p4 = scmp.lt.u32.totalorder %s567_s27, %s678_s0 }
  0x19   : > { %p374_p6 = pnand %p373_p5, %p372_p3  ;;  %p378_p10 = scmp.lt.u32.totalorder %s376_s12, %s371_s3 }
  0x1a   : > { %p380_p12 = scmp.lt.u32.totalorder %s371_s3, %s567_s27 }
  0x1b   : > { %p375_p7 = pneg %p374_p6  ;;  %p379_p13 = por %p378_p10, %p377_p4 }
  0x1d   : > { %p381_p1 = por %p380_p12, %p379_p13 }
  0x1f   : > { %p382_p2 = pnand %p381_p1, %p375_p7 }
  0x21   : > { %385 = shalt.err (!%p382_p2)
}
  0x22   : > { %s386_s16 = scalar_lea.vmem %s569_s29, 128  ;;  %s485_s17 = smov [#allocation2]  }
  0x23   : > { %p387_p3 = scmp.ne.s32.totalorder %s569_s29, %s386_s16  ;;  %s391_s22 = sshll.u32 %s485_s17, 4  ;;  %s392_s22 = int_to_ptr.vmem [resolvable:$false] %s391_s22 }
  0x24   : > { %s393_s23 = scalar_lea.vmem %s392_s22, 256  ;;  %p394_p9 = scmp.lt.s32.totalorder %s569_s29, %s392_s22 }
  0x25   : > { %p389_p6 = pnand %p387_p3, %p373_p5  ;;  %p395_p4 = scmp.lt.s32.totalorder %s393_s23, %s386_s16 }
  0x27   : > { %p390_p11 = pneg %p389_p6  ;;  %p396_p10 = por %p395_p4, %p394_p9 }
  0x29   : > { %p397_p12 = pnand %p396_p10, %p390_p11 }
  0x2b   : > { %400 = shalt.err (!%p397_p12)
}
  0x2c   : > { %311 = dma.hbm_to_vmem [thread:$0]  (!%p573_p0), %s567_s27, 128, %s569_s29, %s104_s2  }
  0x2d   : > { %p686_p1 = scmp.lt.s32.totalorder %s483_s11, 3  ;;  %p687_p2 = scmp.ge.s32.totalorder %s483_s11, 1 }
  0x2f   : > { %p122_p5 = pnand %p687_p2, %p686_p1 }
  0x30   : > { %s609_s24 = sand.u32 (!%p122_p5), 1, %s467_s7  }
  0x31   : > { %125 = sbr.rel (%p122_p5) target bundleno = 111 (0x6f), region = 24  ;;  %s296_s25 = sshll.u32 (!%p122_p5), %s609_s24, 3 }
  0x32   : > { %s128_s26 = scalar_lea.sflag (!%p122_p5), [#allocation3], %s609_s24  ;;  %s131_s28 = scalar_lea.vmem (!%p122_p5), [#allocation2], %s296_s25 }
  0x38   : > { %454 = dma.done.wait (%p545_p8), %s128_s26, 128  }
  0x39   : > { %456 = vsyncadd (%p545_p8), %s128_s26, 4294967168  ;;  %v152_v0 = vlaneseq  ;;  %v150_v2 = vld [vmem:[%s131_s28] sm:$0xff]  ;;  %v486_v22 = vmov 0.0   ;;  %s149_s18 = scalar_lea.vmem [#allocation5], %s296_s25  ;;  %s301_s29 = sshll.u32 %s475_s9, 7 }
  0x3a   : > { %v151_v3 = vmul.f32 %v150_v2, %v150_v2  ;;  %s207_s27 = sshll.u32 %s149_s18, 4  ;;  %s631_s3 = scalar_lea.hbm %s679_s1, %s301_s29  ;;  %s626_s27 = int_to_ptr.vmem [resolvable:$true] %s207_s27 }
  0x3b   : > { %v153_v1 = vshrl.u32 %v152_v0, 7  ;;  %s192_s4 = scalar_lea.sflag [#allocation4], %s609_s24  ;;  %s401_s5 = scalar_lea.vmem %s626_s27, 128 }
  0x3c   : > { %p402_p8 = scmp.ne.s32.totalorder %s626_s27, %s401_s5  ;;  %p688_p9 = scmp.ne.s32.totalorder %s683_s19, 0 }
  0x3d   : > { %vm155_vm0 = vcmp.lt.s32.totalorder %v153_v1, 4  ;;  %vm171_vm1 = vcmp.ge.s32.totalorder %v153_v1, 4  ;;  %s487_s9 = smov [#allocation5]  }
  0x3e   : > { %v159_v4 = vsel %vm155_vm0, %v151_v3, 0.0  ;;  %v176_v5 = vsel %vm171_vm1, %v151_v3, 0.0  ;;  %v298_v23 = vsel %vm155_vm0, 1.0, %v486_v22  ;;  %v299_v24 = vsel %vm171_vm1, 1.0, %v486_v22  ;;  %p403_p11 = pnand %p402_p8, %p688_p9  ;;  %s405_s12 = sshll.u32 %s487_s9, 4  ;;  %s406_s12 = int_to_ptr.vmem [resolvable:$false] %s405_s12 }
  0x3f   : > { %v160_v6 = vrot.slane %v159_v4, 4  ;;  %v177_v7 = vrot.slane %v176_v5, 4  ;;  %s407_s13 = scalar_lea.vmem %s406_s12, 256  ;;  %p408_p7 = scmp.lt.s32.totalorder %s626_s27, %s406_s12 }
  0x40   : > { %p404_p0 = pneg %p403_p11  ;;  %p409_p13 = scmp.lt.s32.totalorder %s407_s13, %s401_s5 }
  0x41   : > { %v161_v8 = vadd.f32 %v160_v6, %v159_v4  ;;  %v178_v9 = vadd.f32 %v177_v7, %v176_v5 }
  0x42   : > { %p410_p3 = por %p409_p13, %p408_p7 }
  0x43   : > { %v162_v10 = vrot.slane %v161_v8, 2  ;;  %v179_v11 = vrot.slane %v178_v9, 2 }
  0x44   : > { %p411_p6 = pnand %p410_p3, %p404_p0 }
  0x45   : > { %v163_v12 = vadd.f32 %v162_v10, %v161_v8  ;;  %v180_v13 = vadd.f32 %v179_v11, %v178_v9 }
  0x47   : > { %v164_v14 = vrot.slane %v163_v12, 1  ;;  %v181_v15 = vrot.slane %v180_v13, 1 }
  0x49   : > { %v165_v16 = vadd.f32 %v164_v14, %v163_v12  ;;  %v182_v17 = vadd.f32 %v181_v15, %v180_v13 }
  0x4b   : > { %v166_v18 = vmul.f32 0.25, %v165_v16  ;;  %v183_v19 = vmul.f32 0.25, %v182_v17 }
  0x4d   : > { %v167_v20 = vadd.f32 1e-08, %v166_v18  ;;  %v184_v21 = vadd.f32 1e-08, %v183_v19 }
  0x4f   : > { %367 = vrsqrt.f32 %v167_v20 }
  0x50   : > { %369 = vrsqrt.f32 %v184_v21 }
  0x59   : > { %v368_v25 = vpop.eup %367 }
  0x5a   : > { %v370_v26 = vpop.eup %369  ;;  %v170_v27 = vmul.f32 %v368_v25, %v298_v23 }
  0x5b   : > { %v187_v28 = vmul.f32 %v370_v26, %v299_v24 }
  0x5d   : > { %v188_v29 = vadd.f32 %v187_v28, %v170_v27 }
  0x5f   : > { %v189_v30 = vmul.f32 %v188_v29, %v150_v2 }
  0x61   : > { %190 = vst [vmem:[%s149_s18] sm:$0xff] %v189_v30 }
  0x62   : > { %414 = shalt.err (!%p411_p6)
}
  0x63   : > { %s415_s15 = scalar_lea.hbm %s631_s3, 128  ;;  %s419_s22 = scalar_lea.hbm %s679_s1, 256 }
  0x64   : > { %p416_p4 = scmp.ne.s32.totalorder %s631_s3, %s415_s15  ;;  %p420_p1 = scmp.lt.u32.totalorder %s631_s3, %s679_s1 }
  0x65   : > { %p421_p2 = scmp.lt.u32.totalorder %s419_s22, %s415_s15  ;;  %p423_p8 = scmp.lt.u32.totalorder %s415_s15, %s631_s3 }
  0x66   : > { %p417_p10 = pnand %p416_p4, %p688_p9 }
  0x67   : > { %p422_p5 = por %p421_p2, %p420_p1 }
  0x68   : > { %p418_p12 = pneg %p417_p10 }
  0x69   : > { %p424_p11 = por %p423_p8, %p422_p5 }
  0x6b   : > { %p425_p0 = pnand %p424_p11, %p418_p12 }
  0x6d   : > { %428 = shalt.err (!%p425_p0)
}
  0x6e   : > { %306 = dma.vmem_to_hbm [thread:$0]  (%p688_p9), %s626_s27, 128, %s631_s3, %s192_s4  }
  0x6f PF: > { %s219_s25 = sand.u32 1, %s463_s6   ;;  %p689_p7 = scmp.ne.s32.totalorder %s684_s21, 0 }
  0x70   : > { %p690_p13 = scmp.ge.s32.totalorder %s483_s11, 2  ;;  %s220_s26 = scalar_lea.sflag [#allocation4], %s219_s25 }
  0x72   : > { %p313_p3 = pnand %p690_p13, %p689_p7 }
  0x74   : > { %458 = dma.done.wait (!%p313_p3), %s220_s26, 128  }
  0x75   : > { %460 = vsyncadd (!%p313_p3), %s220_s26, 4294967168  ;;  %s17_s11 = sadd.s32 1, %s483_s11   ;;  %s691_s6 = smov %s467_s7 }
  0x76   : > { %p14_p6 = scmp.ge.s32.totalorder %s17_s11, 4   ;;  %s692_s7 = smov %s471_s8 }
  0x77   : > { %s693_s8 = smov %s554_s20  ;;  %s694_s9 = smov %s479_s10 }
  0x78   : > { %s695_s10 = smov %s697_s14  ;;  %16 = sbr.rel (!%p14_p6) target bundleno = 6 (0x6), region = 69 }
  0x7f   :  { %225 = vsyncpa [#allocation3], 1 }
  0x80   :  { %227 = vsyncpa [#allocation3 + $0x1], 1 }
  0x81   :  { %228 = vsyncpa [#allocation4], 1 }
  0x82   :  { %230 = vsyncpa [#allocation4 + $0x1], 1 }

</bundles_post_ra>
